<compile_context>
chip_gen: v7x
topology: tpu7x:2x2x1
jax: 0.10.0
libtpu: 0.0.40
codegen_flags: <defaults>
</compile_context>

<pallas_src>
import functools

import jax
import jax.numpy as jnp
from jax import lax
from jax.experimental import pallas as pl
from jax.experimental.pallas import tpu as pltpu


_NEG_BIG = -1e18   # same masking sentinel as the reference
_PAD_NEG = -1e30   # log-softmax vocab-padding bias


def _erf(x):
    # Abramowitz & Stegun 7.1.26 (|err| <= 1.5e-7): only exp / mul / select, so it
    # lowers on the VPU+EUP without needing an erf primitive in Mosaic.
    a1, a2, a3, a4, a5 = 0.254829592, -0.284496736, 1.421413741, -1.453152027, 1.061405429
    p = 0.3275911
    ax = jnp.abs(x)
    t = 1.0 / (1.0 + p * ax)
    poly = ((((a5 * t + a4) * t + a3) * t + a2) * t + a1) * t
    y = 1.0 - poly * jnp.exp(-ax * ax)
    return jnp.where(x >= 0, y, -y)


def _gelu_exact(x):
    # matches torch.nn.GELU() default (erf-based) numerics
    return 0.5 * x * (1.0 + _erf(x * 0.7071067811865475))


# ----------------------------------------------------------------------------
# Fused cross-encoder kernel: one grid step per batch element.
# ----------------------------------------------------------------------------

def _fused_cross_kernel(gnum_ref,
                        phar_flat_ref, phar_ref, repr_ref, text_ref,
                        pw1_ref, pb1_ref, pw2_ref, pb2_ref,
                        lw1_ref, lb1_ref, lw2_ref, lb2_ref,
                        g1t_ref, g1b_ref, gb1_ref, g2_ref, gb2_ref,
                        o_wge_ref, o_pred_ref):
    b = pl.program_id(0)
    n_valid = gnum_ref[b]

    # ---- prompt_projection_model: Linear(Q*d_g -> d_g) / GELU / Linear(d_g -> d_g)
    h = jnp.dot(phar_flat_ref[...], pw1_ref[...],
                preferred_element_type=jnp.float32) + pb1_ref[...]
    mp = jnp.dot(_gelu_exact(h), pw2_ref[...],
                 preferred_element_type=jnp.float32) + pb2_ref[...]          # (1, d_g)

    # ---- prompt_linear_model: Linear(d_g -> d_g) / GELU / Linear(d_g -> 1)
    ph = phar_ref[...]                                                       # (Q, d_g)
    h2 = jnp.dot(ph, lw1_ref[...], preferred_element_type=jnp.float32) + lb1_ref[...]
    o_pred_ref[...] = jnp.dot(_gelu_exact(h2), lw2_ref[...],
                              preferred_element_type=jnp.float32) + lb2_ref[...]  # (Q, 1)

    # ---- gnn_z on concat(prompt_bcast, repr) with split W1 (no concat materialized)
    rep = repr_ref[...]                                                      # (N, d_g)
    h3 = (jnp.dot(rep, g1b_ref[...], preferred_element_type=jnp.float32)
          + jnp.dot(mp, g1t_ref[...], preferred_element_type=jnp.float32)    # bcast over N
          + gb1_ref[...])
    gz = jnp.dot(jnp.maximum(h3, 0.0), g2_ref[...],
                 preferred_element_type=jnp.float32) + gb2_ref[...]          # (N, d_model)

    # ---- text<->graph similarity + double softmax, computed transposed as (N, S)
    x = text_ref[...]                                                        # (S, d_model)
    simT = lax.dot_general(gz, x, (((1,), (1,)), ((), ())),
                           preferred_element_type=jnp.float32)               # (N, S)
    rowNS = lax.broadcasted_iota(jnp.int32, simT.shape, 0)
    simT = jnp.where(rowNS >= n_valid, _NEG_BIG, simT)

    # softmax over the graph-node axis (axis 0) per text position
    m0 = jnp.max(simT, axis=0, keepdims=True)
    e0 = jnp.exp(simT - m0)
    p = e0 * pl.reciprocal(jnp.sum(e0, axis=0, keepdims=True), approx=True)

    s = jnp.sum(p, axis=1, keepdims=True)                                    # (N, 1)
    rowN = lax.broadcasted_iota(jnp.int32, s.shape, 0)
    s = jnp.where(rowN >= n_valid, _NEG_BIG, s)
    m1 = jnp.max(s, axis=0, keepdims=True)
    e1 = jnp.exp(s - m1)
    w = e1 * pl.reciprocal(jnp.sum(e1, axis=0, keepdims=True), approx=True)  # (N, 1)

    # weighted_batch_graph_embed = w * concat(prompt_bcast, repr): one full-tile store
    o_wge_ref[...] = w * jnp.concatenate(
        [jnp.broadcast_to(mp, rep.shape), rep], axis=-1)


def fused_cross_encoder(phar, repr_, text_bsd, graph_num, params):
    B, Q, d_g = phar.shape
    N = repr_.shape[1]
    S, d_model = text_bsd.shape[1], text_bsd.shape[2]

    # flatten in the wrapper (free); keep a unit dim so the block's last-two dims
    # always equal the full array dims (batch dim is squeezed out of the BlockSpec)
    phar_flat = phar.reshape(B, 1, Q * d_g)
    w1_top = params["gnn_w1"][:d_g]                   # prompt half of gnn_z first linear
    w1_bot = params["gnn_w1"][d_g:]                   # node   half of gnn_z first linear

    grid_spec = pltpu.PrefetchScalarGridSpec(
        num_scalar_prefetch=1,                        # graph_num -> SMEM
        grid=(B,),
        in_specs=[
            pl.BlockSpec((None, 1, Q * d_g), lambda b, gn: (b, 0, 0)),
            pl.BlockSpec((None, Q, d_g), lambda b, gn: (b, 0, 0)),
            pl.BlockSpec((None, N, d_g), lambda b, gn: (b, 0, 0)),
            pl.BlockSpec((None, S, d_model), lambda b, gn: (b, 0, 0)),
            # weights / biases: constant block index -> stay resident in VMEM across B
            pl.BlockSpec((Q * d_g, d_g), lambda b, gn: (0, 0)),
            pl.BlockSpec((1, d_g), lambda b, gn: (0, 0)),
            pl.BlockSpec((d_g, d_g), lambda b, gn: (0, 0)),
            pl.BlockSpec((1, d_g), lambda b, gn: (0, 0)),
            pl.BlockSpec((d_g, d_g), lambda b, gn: (0, 0)),
            pl.BlockSpec((1, d_g), lambda b, gn: (0, 0)),
            pl.BlockSpec((d_g, 1), lambda b, gn: (0, 0)),
            pl.BlockSpec((1, 1), lambda b, gn: (0, 0)),
            pl.BlockSpec((d_g, d_model), lambda b, gn: (0, 0)),
            pl.BlockSpec((d_g, d_model), lambda b, gn: (0, 0)),
            pl.BlockSpec((1, d_model), lambda b, gn: (0, 0)),
            pl.BlockSpec((d_model, d_model), lambda b, gn: (0, 0)),
            pl.BlockSpec((1, d_model), lambda b, gn: (0, 0)),
        ],
        out_specs=(
            pl.BlockSpec((None, N, 2 * d_g), lambda b, gn: (b, 0, 0)),
            pl.BlockSpec((None, Q, 1), lambda b, gn: (b, 0, 0)),
        ),
    )

    wge, pred = pl.pallas_call(
        _fused_cross_kernel,
        grid_spec=grid_spec,
        out_shape=(jax.ShapeDtypeStruct((B, N, 2 * d_g), jnp.float32),
                   jax.ShapeDtypeStruct((B, Q, 1), jnp.float32)),
        compiler_params=pltpu.CompilerParams(dimension_semantics=("parallel",)),
    )(graph_num, phar_flat, phar, repr_, text_bsd,
      params["proj_w1"], params["proj_b1"], params["proj_w2"], params["proj_b2"],
      params["lin_w1"], params["lin_b1"], params["lin_w2"], params["lin_b2"],
      w1_top, w1_bot, params["gnn_b1"], params["gnn_w2"], params["gnn_b2"])
    return wge, pred[..., 0]


# ----------------------------------------------------------------------------
# Generator: Linear -> LogSoftmax, tiled over (row tiles, vocab tiles)
# with an online max/sum in VMEM scratch.
# ----------------------------------------------------------------------------

def _generator_kernel(x_ref, w_ref, b_ref, o_ref, lse_ref, m_sc, l_sc, *, single_tile):
    j = pl.program_id(1)

    @pl.when(j == 0)
    def _():
        m_sc[...] = jnp.full(m_sc.shape, _PAD_NEG, jnp.float32)
        l_sc[...] = jnp.zeros(l_sc.shape, jnp.float32)

    z = jnp.dot(x_ref[...], w_ref[...], preferred_element_type=jnp.float32) + b_ref[...]
    m_new = jnp.maximum(m_sc[...], jnp.max(z, axis=-1, keepdims=True))
    l_new = (l_sc[...] * jnp.exp(m_sc[...] - m_new)
             + jnp.sum(jnp.exp(z - m_new), axis=-1, keepdims=True))
    m_sc[...] = m_new
    l_sc[...] = l_new

    if single_tile:
        # whole (padded) vocab is one lane-dense tile: finish log-softmax in-kernel
        o_ref[...] = z - (m_new + jnp.log(l_new))
    else:
        o_ref[...] = z   # raw logits; normalized with the LSE output in the wrapper

    @pl.when(j == pl.num_programs(1) - 1)
    def _():
        lse_ref[...] = m_sc[...] + jnp.log(l_sc[...])


def generator_head(x, w, b, *, tm=8, tv=128):
    # tm/tv are sized for the tiny test shapes; at production sizes use tm=128..256 and
    # tv a multiple of 256 (v6e/v7x MXU) sized so 2*(D*tv)*4B + tm*tv*4B stays within the
    # ~32 MiB default scoped VMEM (v7x only has 64 MiB physical VMEM per TC).
    M, D = x.shape
    V = w.shape[1]
    Vp = pl.cdiv(V, tv) * tv          # lane-dense, unmasked stores
    Mp = pl.cdiv(M, tm) * tm
    kv = Vp // tv

    x_p = jnp.pad(x, ((0, Mp - M), (0, 0)))
    w_p = jnp.pad(w, ((0, 0), (0, Vp - V)))
    b_p = jnp.pad(b, ((0, 0), (0, Vp - V)), constant_values=_PAD_NEG)

    logits, lse = pl.pallas_call(
        functools.partial(_generator_kernel, single_tile=(kv == 1)),
        out_shape=(jax.ShapeDtypeStruct((Mp, Vp), jnp.float32),
                   jax.ShapeDtypeStruct((Mp, 1), jnp.float32)),
        grid=(Mp // tm, kv),
        in_specs=[
            pl.BlockSpec((tm, D), lambda i, j: (i, 0)),
            pl.BlockSpec((D, tv), lambda i, j: (0, j)),
            pl.BlockSpec((1, tv), lambda i, j: (0, j)),
        ],
        out_specs=(
            pl.BlockSpec((tm, tv), lambda i, j: (i, j)),
            pl.BlockSpec((tm, 1), lambda i, j: (i, 0)),
        ),
        scratch_shapes=[pltpu.VMEM((tm, 1), jnp.float32),
                        pltpu.VMEM((tm, 1), jnp.float32)],
        compiler_params=pltpu.CompilerParams(
            dimension_semantics=("parallel", "arbitrary")),
    )(x_p, w_p, b_p)

    if kv == 1:
        return logits[:M, :V]
    # TODO(synk): at production vocab this cheap subtraction is best fused into the
    # downstream NLL loss (which only needs lse + gathered logits).
    return (logits - lse)[:M, :V]


# ----------------------------------------------------------------------------
# Parameter construction (std=0.02 normal / zero bias, mirroring init_params)
# ----------------------------------------------------------------------------

def _linear(key, din, dout, std=0.02):
    w = std * jax.random.normal(key, (din, dout), jnp.float32)
    b = jnp.zeros((1, dout), jnp.float32)
    return w, b


def make_params(key, d_model, d_g, num_questions, vocab_tgt):
    ks = jax.random.split(key, 8)
    params = {}
    # prompt_projection_model: Linear(Q*d_g -> d_g) / GELU / Linear(d_g -> d_g)
    params["proj_w1"], params["proj_b1"] = _linear(ks[0], num_questions * d_g, d_g)
    params["proj_w2"], params["proj_b2"] = _linear(ks[1], d_g, d_g)
    # prompt_linear_model: Linear(d_g -> d_g) / GELU / Linear(d_g -> 1)
    params["lin_w1"], params["lin_b1"] = _linear(ks[2], d_g, d_g)
    params["lin_w2"], params["lin_b2"] = _linear(ks[3], d_g, 1)
    # gnn_z: Linear(2*d_g -> d_model) / ReLU / Linear(d_model -> d_model)
    params["gnn_w1"], params["gnn_b1"] = _linear(ks[4], 2 * d_g, d_model)
    params["gnn_w2"], params["gnn_b2"] = _linear(ks[5], d_model, d_model)
    # generator: Linear(d_model -> vocab_tgt) + LogSoftmax
    params["gen_w"], params["gen_b"] = _linear(ks[6], d_model, vocab_tgt)
    return params


# ----------------------------------------------------------------------------
# Forward pass (the compute defined in retro_model / get_predictor itself)
# ----------------------------------------------------------------------------

def retro_forward(params,
                  molecules_phar_prompt,   # (B, Q, d_g)       stand-in: embedding_model.forward_tune
                  molecules_repr,          # (B, N, d_g)       stand-in: embedding_model.get_node_feat
                  input_attention_mask,    # (B, N)            stand-in: get_node_feat mask
                  text_out,                # (S, B, d_model)   stand-in: self.text_encoder output
                  decoder_out,             # (T-1, B, d_model) stand-in: self.decoder output
                  graph_num):              # (B,) int32        valid node counts per graph
    d_model = text_out.shape[2]

    text_bsd = jnp.transpose(text_out, (1, 0, 2))      # (B, S, d_model) glue transpose

    # ---- fused get_graph_feature + gnn_z + similarity/softmax weighting ----
    weighted_batch_graph_embed, pred_phar_num = fused_cross_encoder(
        molecules_phar_prompt, molecules_repr, text_bsd, graph_num, params)
    # TODO(synk): reference casts pred_phar_num to torch.float64; kept float32 (no f64 on TPU).

    graph_mask = (1.0 - input_attention_mask)[:, None, :]   # (B, 1, N)

    # TODO(synk): graph-conditioned TransformerEncoder and TransformerDecoder are external
    # modules not defined in the reference source; decoder_out is a stand-in input.

    # ---- generator ----
    Tm1, Bd, _ = decoder_out.shape
    generative_scores = generator_head(
        decoder_out.reshape(Tm1 * Bd, d_model), params["gen_w"], params["gen_b"]
    ).reshape(Tm1, Bd, -1)

    return generative_scores, pred_phar_num, weighted_batch_graph_embed, graph_mask


# ----------------------------------------------------------------------------
# Main
# ----------------------------------------------------------------------------

if __name__ == "__main__":
    B = 2          # batch
    S = 8          # src sequence length
    T = 8          # tgt sequence length (decoder sees T-1)
    N = 8          # graph nodes per molecule (padded)
    d_model = 32
    d_g = 16       # config['d_g_feats']
    Q = 4          # args.num_questions
    vocab_tgt = 24

    key = jax.random.PRNGKey(0)
    k_par, k_in = jax.random.split(key)
    params = make_params(k_par, d_model, d_g, Q, vocab_tgt)

    ki = jax.random.split(k_in, 5)
    molecules_phar_prompt = jax.random.normal(ki[0], (B, Q, d_g), jnp.float32)
    molecules_repr = jax.random.normal(ki[1], (B, N, d_g), jnp.float32)
    graph_num = jnp.array([5, N], dtype=jnp.int32)
    node_ids = jnp.arange(N)[None, :]
    input_attention_mask = (node_ids < graph_num[:, None]).astype(jnp.float32)
    text_out = jax.random.normal(ki[2], (S, B, d_model), jnp.float32)
    decoder_out = jax.random.normal(ki[3], (T - 1, B, d_model), jnp.float32)

    outs = retro_forward(params, molecules_phar_prompt, molecules_repr,
                         input_attention_mask, text_out, decoder_out, graph_num)
    outs = jax.block_until_ready(outs)

    scores, pred_phar_num, weighted_ge, graph_mask = outs
    assert scores.shape == (T - 1, B, vocab_tgt)
    assert pred_phar_num.shape == (B, Q)
    assert weighted_ge.shape == (B, N, 2 * d_g)
    assert graph_mask.shape == (B, 1, N)
    # log-softmax rows must sum to ~1 in prob space
    assert jnp.allclose(jnp.sum(jnp.exp(scores), axis=-1), 1.0, atol=1e-4)

    print("KERNEL_OK")
</pallas_src>

<mosaic_0001>
module attributes {stable_mosaic.version = 11 : i64} {
  func.func @_fused_cross_kernel(%arg0: i32, %arg1: memref<2xi32, #tpu.memory_space<smem>>, %arg2: memref<1x1x64xf32, #tpu.memory_space<vmem>>, %arg3: memref<1x4x16xf32, #tpu.memory_space<vmem>>, %arg4: memref<1x8x16xf32, #tpu.memory_space<vmem>>, %arg5: memref<1x8x32xf32, #tpu.memory_space<vmem>>, %arg6: memref<64x16xf32, #tpu.memory_space<vmem>>, %arg7: memref<1x16xf32, #tpu.memory_space<vmem>>, %arg8: memref<16x16xf32, #tpu.memory_space<vmem>>, %arg9: memref<1x16xf32, #tpu.memory_space<vmem>>, %arg10: memref<16x16xf32, #tpu.memory_space<vmem>>, %arg11: memref<1x16xf32, #tpu.memory_space<vmem>>, %arg12: memref<16x1xf32, #tpu.memory_space<vmem>>, %arg13: memref<1x1xf32, #tpu.memory_space<vmem>>, %arg14: memref<16x32xf32, #tpu.memory_space<vmem>>, %arg15: memref<16x32xf32, #tpu.memory_space<vmem>>, %arg16: memref<1x32xf32, #tpu.memory_space<vmem>>, %arg17: memref<32x32xf32, #tpu.memory_space<vmem>>, %arg18: memref<1x32xf32, #tpu.memory_space<vmem>>, %arg19: memref<1x8x32xf32, #tpu.memory_space<vmem>>, %arg20: memref<1x4x1xf32, #tpu.memory_space<vmem>>) attributes {dimension_semantics = [#tpu.dimension_semantics<parallel>], iteration_bounds = array<i64: 2>, scalar_prefetch = 1 : i64, scratch_operands = 0 : i64, tpu.core_type = #tpu.core_type<tc>, window_params = [{transform_indices = @transform_0, window_bounds = array<i64: 1, 1, 64>}, {transform_indices = @transform_1, window_bounds = array<i64: 1, 4, 16>}, {transform_indices = @transform_2, window_bounds = array<i64: 1, 8, 16>}, {transform_indices = @transform_3, window_bounds = array<i64: 1, 8, 32>}, {pipeline_mode = #tpu.pipeline_mode<synchronous>, transform_indices = @transform_4, window_bounds = array<i64: 64, 16>}, {pipeline_mode = #tpu.pipeline_mode<synchronous>, transform_indices = @transform_5, window_bounds = array<i64: 1, 16>}, {pipeline_mode = #tpu.pipeline_mode<synchronous>, transform_indices = @transform_6, window_bounds = array<i64: 16, 16>}, {pipeline_mode = #tpu.pipeline_mode<synchronous>, transform_indices = @transform_7, window_bounds = array<i64: 1, 16>}, {pipeline_mode = #tpu.pipeline_mode<synchronous>, transform_indices = @transform_8, window_bounds = array<i64: 16, 16>}, {pipeline_mode = #tpu.pipeline_mode<synchronous>, transform_indices = @transform_9, window_bounds = array<i64: 1, 16>}, {pipeline_mode = #tpu.pipeline_mode<synchronous>, transform_indices = @transform_10, window_bounds = array<i64: 16, 1>}, {pipeline_mode = #tpu.pipeline_mode<synchronous>, transform_indices = @transform_11, window_bounds = array<i64: 1, 1>}, {pipeline_mode = #tpu.pipeline_mode<synchronous>, transform_indices = @transform_12, window_bounds = array<i64: 16, 32>}, {pipeline_mode = #tpu.pipeline_mode<synchronous>, transform_indices = @transform_13, window_bounds = array<i64: 16, 32>}, {pipeline_mode = #tpu.pipeline_mode<synchronous>, transform_indices = @transform_14, window_bounds = array<i64: 1, 32>}, {pipeline_mode = #tpu.pipeline_mode<synchronous>, transform_indices = @transform_15, window_bounds = array<i64: 32, 32>}, {pipeline_mode = #tpu.pipeline_mode<synchronous>, transform_indices = @transform_16, window_bounds = array<i64: 1, 32>}, {transform_indices = @transform_17, window_bounds = array<i64: 1, 8, 32>}, {transform_indices = @transform_18, window_bounds = array<i64: 1, 4, 1>}]} {
    %0 = arith.index_cast %arg0 : i32 to index
    %1 = memref.load %arg1[%0] : memref<2xi32, #tpu.memory_space<smem>>
    %c0 = arith.constant 0 : index
    %c0_0 = arith.constant 0 : index
    %c0_1 = arith.constant 0 : index
    %2 = vector.load %arg2[%c0, %c0_0, %c0_1] : memref<1x1x64xf32, #tpu.memory_space<vmem>>, vector<1x1x64xf32>
    %3 = vector.shape_cast %2 : vector<1x1x64xf32> to vector<1x64xf32>
    %c0_2 = arith.constant 0 : index
    %c0_3 = arith.constant 0 : index
    %4 = vector.load %arg6[%c0_2, %c0_3] : memref<64x16xf32, #tpu.memory_space<vmem>>, vector<64x16xf32>
    %cst = arith.constant dense<0.000000e+00> : vector<1x16xf32>
    %5 = tpu.matmul %3, %4, %cst {dimension_numbers = #tpu.dot_dimension_numbers<[1], [0], [0], [1], [0, 0, 1, 1], [], []>} : vector<1x64xf32>, vector<64x16xf32>, vector<1x16xf32> -> vector<1x16xf32>
    %c0_4 = arith.constant 0 : index
    %c0_5 = arith.constant 0 : index
    %6 = vector.load %arg7[%c0_4, %c0_5] : memref<1x16xf32, #tpu.memory_space<vmem>>, vector<1x16xf32>
    %7 = arith.addf %5, %6 : vector<1x16xf32>
    %cst_6 = arith.constant 5.000000e-01 : f32
    %8 = vector.broadcast %cst_6 : f32 to vector<1x16xf32>
    %9 = arith.mulf %8, %7 : vector<1x16xf32>
    %cst_7 = arith.constant 0.707106769 : f32
    %10 = vector.broadcast %cst_7 : f32 to vector<1x16xf32>
    %11 = arith.mulf %7, %10 : vector<1x16xf32>
    %12 = math.absf %11 : vector<1x16xf32>
    %cst_8 = arith.constant 0.327591091 : f32
    %13 = vector.broadcast %cst_8 : f32 to vector<1x16xf32>
    %14 = arith.mulf %13, %12 : vector<1x16xf32>
    %cst_9 = arith.constant 1.000000e+00 : f32
    %15 = vector.broadcast %cst_9 : f32 to vector<1x16xf32>
    %16 = arith.addf %15, %14 : vector<1x16xf32>
    %cst_10 = arith.constant 1.000000e+00 : f32
    %17 = vector.broadcast %cst_10 : f32 to vector<1x16xf32>
    %18 = arith.divf %17, %16 : vector<1x16xf32>
    %cst_11 = arith.constant 1.06140542 : f32
    %19 = vector.broadcast %cst_11 : f32 to vector<1x16xf32>
    %20 = arith.mulf %19, %18 : vector<1x16xf32>
    %cst_12 = arith.constant -1.45315206 : f32
    %21 = vector.broadcast %cst_12 : f32 to vector<1x16xf32>
    %22 = arith.addf %20, %21 : vector<1x16xf32>
    %23 = arith.mulf %22, %18 : vector<1x16xf32>
    %cst_13 = arith.constant 1.42141378 : f32
    %24 = vector.broadcast %cst_13 : f32 to vector<1x16xf32>
    %25 = arith.addf %23, %24 : vector<1x16xf32>
    %26 = arith.mulf %25, %18 : vector<1x16xf32>
    %cst_14 = arith.constant -0.284496725 : f32
    %27 = vector.broadcast %cst_14 : f32 to vector<1x16xf32>
    %28 = arith.addf %26, %27 : vector<1x16xf32>
    %29 = arith.mulf %28, %18 : vector<1x16xf32>
    %cst_15 = arith.constant 0.254829586 : f32
    %30 = vector.broadcast %cst_15 : f32 to vector<1x16xf32>
    %31 = arith.addf %29, %30 : vector<1x16xf32>
    %32 = arith.mulf %31, %18 : vector<1x16xf32>
    %cst_16 = arith.constant 0.000000e+00 : f32
    %33 = vector.broadcast %cst_16 : f32 to vector<1x16xf32>
    %34 = arith.subf %33, %12 : vector<1x16xf32>
    %35 = arith.mulf %34, %12 : vector<1x16xf32>
    %36 = math.exp %35 : vector<1x16xf32>
    %37 = arith.mulf %32, %36 : vector<1x16xf32>
    %cst_17 = arith.constant 1.000000e+00 : f32
    %38 = vector.broadcast %cst_17 : f32 to vector<1x16xf32>
    %39 = arith.subf %38, %37 : vector<1x16xf32>
    %cst_18 = arith.constant 0.000000e+00 : f32
    %40 = vector.broadcast %cst_18 : f32 to vector<1x16xf32>
    %41 = arith.cmpf oge, %11, %40 : vector<1x16xf32>
    %cst_19 = arith.constant 0.000000e+00 : f32
    %42 = vector.broadcast %cst_19 : f32 to vector<1x16xf32>
    %43 = arith.subf %42, %39 : vector<1x16xf32>
    %44 = arith.select %41, %39, %43 : vector<1x16xi1>, vector<1x16xf32>
    %cst_20 = arith.constant 1.000000e+00 : f32
    %45 = vector.broadcast %cst_20 : f32 to vector<1x16xf32>
    %46 = arith.addf %45, %44 : vector<1x16xf32>
    %47 = arith.mulf %9, %46 : vector<1x16xf32>
    %c0_21 = arith.constant 0 : index
    %c0_22 = arith.constant 0 : index
    %48 = vector.load %arg8[%c0_21, %c0_22] : memref<16x16xf32, #tpu.memory_space<vmem>>, vector<16x16xf32>
    %cst_23 = arith.constant dense<0.000000e+00> : vector<1x16xf32>
    %49 = tpu.matmul %47, %48, %cst_23 {dimension_numbers = #tpu.dot_dimension_numbers<[1], [0], [0], [1], [0, 0, 1, 1], [], []>} : vector<1x16xf32>, vector<16x16xf32>, vector<1x16xf32> -> vector<1x16xf32>
    %c0_24 = arith.constant 0 : index
    %c0_25 = arith.constant 0 : index
    %50 = vector.load %arg9[%c0_24, %c0_25] : memref<1x16xf32, #tpu.memory_space<vmem>>, vector<1x16xf32>
    %51 = arith.addf %49, %50 : vector<1x16xf32>
    %c0_26 = arith.constant 0 : index
    %c0_27 = arith.constant 0 : index
    %c0_28 = arith.constant 0 : index
    %52 = vector.load %arg3[%c0_26, %c0_27, %c0_28] : memref<1x4x16xf32, #tpu.memory_space<vmem>>, vector<1x4x16xf32>
    %53 = vector.shape_cast %52 : vector<1x4x16xf32> to vector<4x16xf32>
    %c0_29 = arith.constant 0 : index
    %c0_30 = arith.constant 0 : index
    %54 = vector.load %arg10[%c0_29, %c0_30] : memref<16x16xf32, #tpu.memory_space<vmem>>, vector<16x16xf32>
    %cst_31 = arith.constant dense<0.000000e+00> : vector<4x16xf32>
    %55 = tpu.matmul %53, %54, %cst_31 {dimension_numbers = #tpu.dot_dimension_numbers<[1], [0], [0], [1], [0, 0, 1, 1], [], []>} : vector<4x16xf32>, vector<16x16xf32>, vector<4x16xf32> -> vector<4x16xf32>
    %c0_32 = arith.constant 0 : index
    %c0_33 = arith.constant 0 : index
    %56 = vector.load %arg11[%c0_32, %c0_33] : memref<1x16xf32, #tpu.memory_space<vmem>>, vector<1x16xf32>
    %57 = vector.broadcast %56 : vector<1x16xf32> to vector<4x16xf32>
    %58 = arith.addf %55, %57 : vector<4x16xf32>
    %cst_34 = arith.constant 5.000000e-01 : f32
    %59 = vector.broadcast %cst_34 : f32 to vector<4x16xf32>
    %60 = arith.mulf %59, %58 : vector<4x16xf32>
    %cst_35 = arith.constant 0.707106769 : f32
    %61 = vector.broadcast %cst_35 : f32 to vector<4x16xf32>
    %62 = arith.mulf %58, %61 : vector<4x16xf32>
    %63 = math.absf %62 : vector<4x16xf32>
    %cst_36 = arith.constant 0.327591091 : f32
    %64 = vector.broadcast %cst_36 : f32 to vector<4x16xf32>
    %65 = arith.mulf %64, %63 : vector<4x16xf32>
    %cst_37 = arith.constant 1.000000e+00 : f32
    %66 = vector.broadcast %cst_37 : f32 to vector<4x16xf32>
    %67 = arith.addf %66, %65 : vector<4x16xf32>
    %cst_38 = arith.constant 1.000000e+00 : f32
    %68 = vector.broadcast %cst_38 : f32 to vector<4x16xf32>
    %69 = arith.divf %68, %67 : vector<4x16xf32>
    %cst_39 = arith.constant 1.06140542 : f32
    %70 = vector.broadcast %cst_39 : f32 to vector<4x16xf32>
    %71 = arith.mulf %70, %69 : vector<4x16xf32>
    %cst_40 = arith.constant -1.45315206 : f32
    %72 = vector.broadcast %cst_40 : f32 to vector<4x16xf32>
    %73 = arith.addf %71, %72 : vector<4x16xf32>
    %74 = arith.mulf %73, %69 : vector<4x16xf32>
    %cst_41 = arith.constant 1.42141378 : f32
    %75 = vector.broadcast %cst_41 : f32 to vector<4x16xf32>
    %76 = arith.addf %74, %75 : vector<4x16xf32>
    %77 = arith.mulf %76, %69 : vector<4x16xf32>
    %cst_42 = arith.constant -0.284496725 : f32
    %78 = vector.broadcast %cst_42 : f32 to vector<4x16xf32>
    %79 = arith.addf %77, %78 : vector<4x16xf32>
    %80 = arith.mulf %79, %69 : vector<4x16xf32>
    %cst_43 = arith.constant 0.254829586 : f32
    %81 = vector.broadcast %cst_43 : f32 to vector<4x16xf32>
    %82 = arith.addf %80, %81 : vector<4x16xf32>
    %83 = arith.mulf %82, %69 : vector<4x16xf32>
    %cst_44 = arith.constant 0.000000e+00 : f32
    %84 = vector.broadcast %cst_44 : f32 to vector<4x16xf32>
    %85 = arith.subf %84, %63 : vector<4x16xf32>
    %86 = arith.mulf %85, %63 : vector<4x16xf32>
    %87 = math.exp %86 : vector<4x16xf32>
    %88 = arith.mulf %83, %87 : vector<4x16xf32>
    %cst_45 = arith.constant 1.000000e+00 : f32
    %89 = vector.broadcast %cst_45 : f32 to vector<4x16xf32>
    %90 = arith.subf %89, %88 : vector<4x16xf32>
    %cst_46 = arith.constant 0.000000e+00 : f32
    %91 = vector.broadcast %cst_46 : f32 to vector<4x16xf32>
    %92 = arith.cmpf oge, %62, %91 : vector<4x16xf32>
    %cst_47 = arith.constant 0.000000e+00 : f32
    %93 = vector.broadcast %cst_47 : f32 to vector<4x16xf32>
    %94 = arith.subf %93, %90 : vector<4x16xf32>
    %95 = arith.select %92, %90, %94 : vector<4x16xi1>, vector<4x16xf32>
    %cst_48 = arith.constant 1.000000e+00 : f32
    %96 = vector.broadcast %cst_48 : f32 to vector<4x16xf32>
    %97 = arith.addf %96, %95 : vector<4x16xf32>
    %98 = arith.mulf %60, %97 : vector<4x16xf32>
    %c0_49 = arith.constant 0 : index
    %c0_50 = arith.constant 0 : index
    %99 = vector.load %arg12[%c0_49, %c0_50] : memref<16x1xf32, #tpu.memory_space<vmem>>, vector<16x1xf32>
    %cst_51 = arith.constant dense<0.000000e+00> : vector<4x1xf32>
    %100 = tpu.matmul %98, %99, %cst_51 {dimension_numbers = #tpu.dot_dimension_numbers<[1], [0], [0], [1], [0, 0, 1, 1], [], []>} : vector<4x16xf32>, vector<16x1xf32>, vector<4x1xf32> -> vector<4x1xf32>
    %c0_52 = arith.constant 0 : index
    %c0_53 = arith.constant 0 : index
    %101 = vector.load %arg13[%c0_52, %c0_53] : memref<1x1xf32, #tpu.memory_space<vmem>>, vector<1x1xf32>
    %102 = vector.broadcast %101 : vector<1x1xf32> to vector<4x1xf32>
    %103 = arith.addf %100, %102 : vector<4x1xf32>
    %c0_54 = arith.constant 0 : index
    %c0_55 = arith.constant 0 : index
    %c0_56 = arith.constant 0 : index
    %104 = vector.load %arg20[%c0_54, %c0_55, %c0_56] : memref<1x4x1xf32, #tpu.memory_space<vmem>>, vector<1x4x1xf32>
    %105 = vector.shape_cast %104 : vector<1x4x1xf32> to vector<4x1xf32>
    %106 = vector.shape_cast %103 : vector<4x1xf32> to vector<1x4x1xf32>
    tpu.vector_store %arg20[%c0_54, %c0_55, %c0_56], %106 {strides = array<i32>} : memref<1x4x1xf32, #tpu.memory_space<vmem>>, vector<1x4x1xf32>,
    %c0_57 = arith.constant 0 : index
    %c0_58 = arith.constant 0 : index
    %c0_59 = arith.constant 0 : index
    %107 = vector.load %arg4[%c0_57, %c0_58, %c0_59] : memref<1x8x16xf32, #tpu.memory_space<vmem>>, vector<1x8x16xf32>
    %108 = vector.shape_cast %107 : vector<1x8x16xf32> to vector<8x16xf32>
    %c0_60 = arith.constant 0 : index
    %c0_61 = arith.constant 0 : index
    %109 = vector.load %arg15[%c0_60, %c0_61] : memref<16x32xf32, #tpu.memory_space<vmem>>, vector<16x32xf32>
    %cst_62 = arith.constant dense<0.000000e+00> : vector<8x32xf32>
    %110 = tpu.matmul %108, %109, %cst_62 {dimension_numbers = #tpu.dot_dimension_numbers<[1], [0], [0], [1], [0, 0, 1, 1], [], []>} : vector<8x16xf32>, vector<16x32xf32>, vector<8x32xf32> -> vector<8x32xf32>
    %c0_63 = arith.constant 0 : index
    %c0_64 = arith.constant 0 : index
    %111 = vector.load %arg14[%c0_63, %c0_64] : memref<16x32xf32, #tpu.memory_space<vmem>>, vector<16x32xf32>
    %cst_65 = arith.constant dense<0.000000e+00> : vector<1x32xf32>
    %112 = tpu.matmul %51, %111, %cst_65 {dimension_numbers = #tpu.dot_dimension_numbers<[1], [0], [0], [1], [0, 0, 1, 1], [], []>} : vector<1x16xf32>, vector<16x32xf32>, vector<1x32xf32> -> vector<1x32xf32>
    %113 = vector.broadcast %112 : vector<1x32xf32> to vector<8x32xf32>
    %114 = arith.addf %110, %113 : vector<8x32xf32>
    %c0_66 = arith.constant 0 : index
    %c0_67 = arith.constant 0 : index
    %115 = vector.load %arg16[%c0_66, %c0_67] : memref<1x32xf32, #tpu.memory_space<vmem>>, vector<1x32xf32>
    %116 = vector.broadcast %115 : vector<1x32xf32> to vector<8x32xf32>
    %117 = arith.addf %114, %116 : vector<8x32xf32>
    %cst_68 = arith.constant 0.000000e+00 : f32
    %118 = vector.broadcast %cst_68 : f32 to vector<8x32xf32>
    %119 = arith.maximumf %117, %118 : vector<8x32xf32>
    %c0_69 = arith.constant 0 : index
    %c0_70 = arith.constant 0 : index
    %120 = vector.load %arg17[%c0_69, %c0_70] : memref<32x32xf32, #tpu.memory_space<vmem>>, vector<32x32xf32>
    %cst_71 = arith.constant dense<0.000000e+00> : vector<8x32xf32>
    %121 = tpu.matmul %119, %120, %cst_71 {dimension_numbers = #tpu.dot_dimension_numbers<[1], [0], [0], [1], [0, 0, 1, 1], [], []>} : vector<8x32xf32>, vector<32x32xf32>, vector<8x32xf32> -> vector<8x32xf32>
    %c0_72 = arith.constant 0 : index
    %c0_73 = arith.constant 0 : index
    %122 = vector.load %arg18[%c0_72, %c0_73] : memref<1x32xf32, #tpu.memory_space<vmem>>, vector<1x32xf32>
    %123 = vector.broadcast %122 : vector<1x32xf32> to vector<8x32xf32>
    %124 = arith.addf %121, %123 : vector<8x32xf32>
    %c0_74 = arith.constant 0 : index
    %c0_75 = arith.constant 0 : index
    %c0_76 = arith.constant 0 : index
    %125 = vector.load %arg5[%c0_74, %c0_75, %c0_76] : memref<1x8x32xf32, #tpu.memory_space<vmem>>, vector<1x8x32xf32>
    %126 = vector.shape_cast %125 : vector<1x8x32xf32> to vector<8x32xf32>
    %cst_77 = arith.constant dense<0.000000e+00> : vector<8x8xf32>
    %127 = tpu.matmul %124, %126, %cst_77 {dimension_numbers = #tpu.dot_dimension_numbers<[1], [1], [0], [0], [0, 0, 1, 0], [], []>} : vector<8x32xf32>, vector<8x32xf32>, vector<8x8xf32> -> vector<8x8xf32>
    %128 = tpu.iota {dimensions = array<i32: 0>} : vector<8x8xi32>
    %129 = vector.broadcast %1 : i32 to vector<8x8xi32>
    %130 = arith.cmpi sge, %128, %129 : vector<8x8xi32>
    %cst_78 = arith.constant -9.99999984E+17 : f32
    %131 = vector.broadcast %cst_78 : f32 to vector<8x8xf32>
    %132 = arith.select %130, %131, %127 : vector<8x8xi1>, vector<8x8xf32>
    %cst_79 = arith.constant dense<0xFF800000> : vector<8xf32>
    %133 = vector.multi_reduction <maximumf>, %132, %cst_79 [0] : vector<8x8xf32> to vector<8xf32>
    %134 = vector.shape_cast %133 : vector<8xf32> to vector<1x8xf32>
    %135 = vector.broadcast %134 : vector<1x8xf32> to vector<8x8xf32>
    %136 = arith.subf %132, %135 : vector<8x8xf32>
    %137 = math.exp %136 : vector<8x8xf32>
    %cst_80 = arith.constant dense<0.000000e+00> : vector<8xf32>
    %138 = vector.multi_reduction <add>, %137, %cst_80 [0] : vector<8x8xf32> to vector<8xf32>
    %139 = vector.shape_cast %138 : vector<8xf32> to vector<1x8xf32>
    %140 = tpu.reciprocal %139 {approx = true} : vector<1x8xf32> -> vector<1x8xf32>
    %141 = vector.broadcast %140 : vector<1x8xf32> to vector<8x8xf32>
    %142 = arith.mulf %137, %141 : vector<8x8xf32>
    %cst_81 = arith.constant dense<0.000000e+00> : vector<8xf32>
    %143 = vector.multi_reduction <add>, %142, %cst_81 [1] : vector<8x8xf32> to vector<8xf32>
    %144 = vector.shape_cast %143 : vector<8xf32> to vector<8x1xf32>
    %145 = tpu.iota {dimensions = array<i32: 0>} : vector<8x1xi32>
    %146 = vector.broadcast %1 : i32 to vector<8x1xi32>
    %147 = arith.cmpi sge, %145, %146 : vector<8x1xi32>
    %cst_82 = arith.constant -9.99999984E+17 : f32
    %148 = vector.broadcast %cst_82 : f32 to vector<8x1xf32>
    %149 = arith.select %147, %148, %144 : vector<8x1xi1>, vector<8x1xf32>
    %cst_83 = arith.constant dense<0xFF800000> : vector<1xf32>
    %150 = vector.multi_reduction <maximumf>, %149, %cst_83 [0] : vector<8x1xf32> to vector<1xf32>
    %151 = vector.shape_cast %150 : vector<1xf32> to vector<1x1xf32>
    %152 = vector.broadcast %151 : vector<1x1xf32> to vector<8x1xf32>
    %153 = arith.subf %149, %152 : vector<8x1xf32>
    %154 = math.exp %153 : vector<8x1xf32>
    %cst_84 = arith.constant dense<0.000000e+00> : vector<1xf32>
    %155 = vector.multi_reduction <add>, %154, %cst_84 [0] : vector<8x1xf32> to vector<1xf32>
    %156 = vector.shape_cast %155 : vector<1xf32> to vector<1x1xf32>
    %157 = tpu.reciprocal %156 {approx = true} : vector<1x1xf32> -> vector<1x1xf32>
    %158 = vector.broadcast %157 : vector<1x1xf32> to vector<8x1xf32>
    %159 = arith.mulf %154, %158 : vector<8x1xf32>
    %160 = vector.shape_cast %51 : vector<1x16xf32> to vector<1x16xf32>
    %161 = vector.broadcast %160 : vector<1x16xf32> to vector<8x16xf32>
    %162 = tpu.concatenate %161, %108 in 1 : vector<8x16xf32>, vector<8x16xf32> -> vector<8x32xf32>
    %163 = vector.broadcast %159 : vector<8x1xf32> to vector<8x32xf32>
    %164 = arith.mulf %163, %162 : vector<8x32xf32>
    %c0_85 = arith.constant 0 : index
    %c0_86 = arith.constant 0 : index
    %c0_87 = arith.constant 0 : index
    %165 = vector.load %arg19[%c0_85, %c0_86, %c0_87] : memref<1x8x32xf32, #tpu.memory_space<vmem>>, vector<1x8x32xf32>
    %166 = vector.shape_cast %165 : vector<1x8x32xf32> to vector<8x32xf32>
    %167 = vector.shape_cast %164 : vector<8x32xf32> to vector<1x8x32xf32>
    tpu.vector_store %arg19[%c0_85, %c0_86, %c0_87], %167 {strides = array<i32>} : memref<1x8x32xf32, #tpu.memory_space<vmem>>, vector<1x8x32xf32>,
    return
  }
  func.func @transform_0(%arg0: i32, %arg1: memref<2xi32, #tpu.memory_space<smem>>) -> (i32, i32, i32) {
    %c0_i32 = arith.constant 0 : i32
    %c0_i32_0 = arith.constant 0 : i32
    %c0_i32_1 = arith.constant 0 : i32
    return %arg0, %c0_i32, %c0_i32_0 : i32, i32, i32
  }
  func.func @transform_1(%arg0: i32, %arg1: memref<2xi32, #tpu.memory_space<smem>>) -> (i32, i32, i32) {
    %c0_i32 = arith.constant 0 : i32
    %c0_i32_0 = arith.constant 0 : i32
    %c0_i32_1 = arith.constant 0 : i32
    return %arg0, %c0_i32, %c0_i32_0 : i32, i32, i32
  }
  func.func @transform_2(%arg0: i32, %arg1: memref<2xi32, #tpu.memory_space<smem>>) -> (i32, i32, i32) {
    %c0_i32 = arith.constant 0 : i32
    %c0_i32_0 = arith.constant 0 : i32
    %c0_i32_1 = arith.constant 0 : i32
    return %arg0, %c0_i32, %c0_i32_0 : i32, i32, i32
  }
  func.func @transform_3(%arg0: i32, %arg1: memref<2xi32, #tpu.memory_space<smem>>) -> (i32, i32, i32) {
    %c0_i32 = arith.constant 0 : i32
    %c0_i32_0 = arith.constant 0 : i32
    %c0_i32_1 = arith.constant 0 : i32
    return %arg0, %c0_i32, %c0_i32_0 : i32, i32, i32
  }
  func.func @transform_4(%arg0: i32, %arg1: memref<2xi32, #tpu.memory_space<smem>>) -> (i32, i32) {
    %c0_i32 = arith.constant 0 : i32
    %c0_i32_0 = arith.constant 0 : i32
    %c0_i32_1 = arith.constant 0 : i32
    return %c0_i32, %c0_i32_0 : i32, i32
  }
  func.func @transform_5(%arg0: i32, %arg1: memref<2xi32, #tpu.memory_space<smem>>) -> (i32, i32) {
    %c0_i32 = arith.constant 0 : i32
    %c0_i32_0 = arith.constant 0 : i32
    %c0_i32_1 = arith.constant 0 : i32
    return %c0_i32, %c0_i32_0 : i32, i32
  }
  func.func @transform_6(%arg0: i32, %arg1: memref<2xi32, #tpu.memory_space<smem>>) -> (i32, i32) {
    %c0_i32 = arith.constant 0 : i32
    %c0_i32_0 = arith.constant 0 : i32
    %c0_i32_1 = arith.constant 0 : i32
    return %c0_i32, %c0_i32_0 : i32, i32
  }
  func.func @transform_7(%arg0: i32, %arg1: memref<2xi32, #tpu.memory_space<smem>>) -> (i32, i32) {
    %c0_i32 = arith.constant 0 : i32
    %c0_i32_0 = arith.constant 0 : i32
    %c0_i32_1 = arith.constant 0 : i32
    return %c0_i32, %c0_i32_0 : i32, i32
  }
  func.func @transform_8(%arg0: i32, %arg1: memref<2xi32, #tpu.memory_space<smem>>) -> (i32, i32) {
    %c0_i32 = arith.constant 0 : i32
    %c0_i32_0 = arith.constant 0 : i32
    %c0_i32_1 = arith.constant 0 : i32
    return %c0_i32, %c0_i32_0 : i32, i32
  }
  func.func @transform_9(%arg0: i32, %arg1: memref<2xi32, #tpu.memory_space<smem>>) -> (i32, i32) {
    %c0_i32 = arith.constant 0 : i32
    %c0_i32_0 = arith.constant 0 : i32
    %c0_i32_1 = arith.constant 0 : i32
    return %c0_i32, %c0_i32_0 : i32, i32
  }
  func.func @transform_10(%arg0: i32, %arg1: memref<2xi32, #tpu.memory_space<smem>>) -> (i32, i32) {
    %c0_i32 = arith.constant 0 : i32
    %c0_i32_0 = arith.constant 0 : i32
    %c0_i32_1 = arith.constant 0 : i32
    return %c0_i32, %c0_i32_0 : i32, i32
  }
  func.func @transform_11(%arg0: i32, %arg1: memref<2xi32, #tpu.memory_space<smem>>) -> (i32, i32) {
    %c0_i32 = arith.constant 0 : i32
    %c0_i32_0 = arith.constant 0 : i32
    %c0_i32_1 = arith.constant 0 : i32
    return %c0_i32, %c0_i32_0 : i32, i32
  }
  func.func @transform_12(%arg0: i32, %arg1: memref<2xi32, #tpu.memory_space<smem>>) -> (i32, i32) {
    %c0_i32 = arith.constant 0 : i32
    %c0_i32_0 = arith.constant 0 : i32
    %c0_i32_1 = arith.constant 0 : i32
    return %c0_i32, %c0_i32_0 : i32, i32
  }
  func.func @transform_13(%arg0: i32, %arg1: memref<2xi32, #tpu.memory_space<smem>>) -> (i32, i32) {
    %c0_i32 = arith.constant 0 : i32
    %c0_i32_0 = arith.constant 0 : i32
    %c0_i32_1 = arith.constant 0 : i32
    return %c0_i32, %c0_i32_0 : i32, i32
  }
  func.func @transform_14(%arg0: i32, %arg1: memref<2xi32, #tpu.memory_space<smem>>) -> (i32, i32) {
    %c0_i32 = arith.constant 0 : i32
    %c0_i32_0 = arith.constant 0 : i32
    %c0_i32_1 = arith.constant 0 : i32
    return %c0_i32, %c0_i32_0 : i32, i32
  }
  func.func @transform_15(%arg0: i32, %arg1: memref<2xi32, #tpu.memory_space<smem>>) -> (i32, i32) {
    %c0_i32 = arith.constant 0 : i32
    %c0_i32_0 = arith.constant 0 : i32
    %c0_i32_1 = arith.constant 0 : i32
    return %c0_i32, %c0_i32_0 : i32, i32
  }
  func.func @transform_16(%arg0: i32, %arg1: memref<2xi32, #tpu.memory_space<smem>>) -> (i32, i32) {
    %c0_i32 = arith.constant 0 : i32
    %c0_i32_0 = arith.constant 0 : i32
    %c0_i32_1 = arith.constant 0 : i32
    return %c0_i32, %c0_i32_0 : i32, i32
  }
  func.func @transform_17(%arg0: i32, %arg1: memref<2xi32, #tpu.memory_space<smem>>) -> (i32, i32, i32) {
    %c0_i32 = arith.constant 0 : i32
    %c0_i32_0 = arith.constant 0 : i32
    %c0_i32_1 = arith.constant 0 : i32
    return %arg0, %c0_i32, %c0_i32_0 : i32, i32, i32
  }
  func.func @transform_18(%arg0: i32, %arg1: memref<2xi32, #tpu.memory_space<smem>>) -> (i32, i32, i32) {
    %c0_i32 = arith.constant 0 : i32
    %c0_i32_0 = arith.constant 0 : i32
    %c0_i32_1 = arith.constant 0 : i32
    return %arg0, %c0_i32, %c0_i32_0 : i32, i32, i32
  }
}

</mosaic_0001>

<bundles_post_ra>
// kernel: tpu_custom_call.1
= control target key start
LH: loop header
LB: loop body
LE: loop exit
PB: predicated region body
PF: predicated region fallthrough
CT: control target
= control target key end

     0   :  { %s2479_s0 = inlined_call_operand.hbm [shape: s32[2], index: 0, kind: input, shape index: {}]   ;;  %s2480_s1 = inlined_call_operand.hbm [shape: f32[2,1,64], index: 1, kind: input, shape index: {}]   ;;  %s2481_s2 = inlined_call_operand.hbm [shape: f32[2,4,16], index: 2, kind: input, shape index: {}]   ;;  %s2482_s3 = inlined_call_operand.vmem [shape: f32[2,8,16], index: 3, kind: input, shape index: {}]   ;;  %s2483_s4 = inlined_call_operand.vmem [shape: f32[2,8,32], index: 4, kind: input, shape index: {}]   ;;  %s2484_s5 = inlined_call_operand.vmem [shape: f32[64,16], index: 5, kind: input, shape index: {}]   ;;  %s2485_s6 = inlined_call_operand.vmem [shape: f32[1,16], index: 6, kind: input, shape index: {}]   ;;  %s2486_s7 = inlined_call_operand.vmem [shape: f32[16,16], index: 7, kind: input, shape index: {}]   ;;  %s2487_s8 = inlined_call_operand.vmem [shape: f32[1,16], index: 8, kind: input, shape index: {}]   ;;  %s2488_s9 = inlined_call_operand.vmem [shape: f32[16,16], index: 9, kind: input, shape index: {}]   ;;  %s2489_s10 = inlined_call_operand.vmem [shape: f32[1,16], index: 10, kind: input, shape index: {}]   ;;  %s2490_s11 = inlined_call_operand.vmem [shape: f32[16,1], index: 11, kind: input, shape index: {}]   ;;  %s2491_s13 = inlined_call_operand.vmem [shape: f32[16,32], index: 13, kind: input, shape index: {}]   ;;  %s2492_s14 = inlined_call_operand.vmem [shape: f32[16,32], index: 14, kind: input, shape index: {}]   ;;  %s2493_s15 = inlined_call_operand.vmem [shape: f32[1,32], index: 15, kind: input, shape index: {}]   ;;  %s2494_s16 = inlined_call_operand.vmem [shape: f32[32,32], index: 16, kind: input, shape index: {}]   ;;  %s2495_s17 = inlined_call_operand.vmem [shape: f32[1,32], index: 17, kind: input, shape index: {}]   ;;  %s2496_s18 = inlined_call_operand.hbm [shape: f32[2,8,32], index: 18, kind: output, shape index: {0}]   ;;  %s2497_s19 = inlined_call_operand.vmem [shape: f32[2,4,1], index: 19, kind: output, shape index: {1}]   ;;  %s2498_s12 = inlined_call_operand.<no memory space> [shape: f32[1,1], index: 12, kind: input, shape index: {}]  }
   0x1   :  { %2514 = sst [smem:[#allocation22_spill]] %s2479_s0 }
   0x2   :  { %2515 = sst [smem:[#allocation23_spill]] %s2480_s1  ;;  %s2520_s20 = sld [smem:[#allocation22_spill]] }
   0x3   :  { %2516 = sst [smem:[#allocation24_spill]] %s2481_s2 }
   0x4   :  { %2517 = sst [smem:[#allocation25_spill]] %s2482_s3 }
   0x5   :  { %2518 = sst [smem:[#allocation26_spill]] %s2483_s4 }
   0x6   :  { %2519 = sst [smem:[#allocation27_spill]] %s2496_s18 }
   0x8   :  { %s1836_s4 = scalar_lea.hbm %s2520_s20, 16 }
   0x9   :  { %p1837_p0 = scmp.ne.s32.totalorder %s2520_s20, %s1836_s4  ;;  %p1840_p1 = scmp.lt.u32.totalorder %s1836_s4, %s2520_s20 }
   0xb   :  { %p1842_p2 = pnand %p1840_p1, %p1837_p0 }
   0xd   :  { %1845 = shalt.err (!%p1842_p2)  }
   0xe   :  { %s1980_s23 = smov [#allocation3]   ;;  %v27_v0 = vstv %s2498_s12 }
   0xf   :  { %26 = dma.hbm_to_smem %s2520_s20, 16, %s1980_s23, [#allocation2]  ;;  %28 = vst [vmem:[#allocation4] sm:$0x1] %v27_v0 }
  0x10   :  { %1950 = dma.done.wait [#allocation2], 16 }
  0x11   :  { %1951 = vsyncadd [#allocation2], 4294967280 }
  0x12   :  { %30 = sfence }
  0x13   :  { %31 = vsyncpa [#allocation6], 0 }
  0x14   :  { %33 = vsyncpa [#allocation6 + $0x1], 0 }
  0x15   :  { %34 = vsyncpa [#allocation9], 0 }
  0x16   :  { %36 = vsyncpa [#allocation9 + $0x1], 0 }
  0x17   :  { %37 = vsyncpa [#allocation7], 0 }
  0x18   :  { %39 = vsyncpa [#allocation7 + $0x1], 0  ;;  %s2103_s4 = smov 0   ;;  %s2105_s27 = smov 0  }
  0x19   :  { %s2107_s28 = smov 0   ;;  %s2109_s29 = smov 0  }
  0x1a LB: > { %2521 = sst [smem:[#allocation15_spill]] %s1966_s4  ;;  %s2124_s12 = sadd.s32 4294967295, %s1978_s29   ;;  %s1978_s29 = sphi %s2109_s29, %s2553_s29   ;;  %s1974_s28 = sphi %s2107_s28, %s2555_s28   ;;  %s1970_s27 = sphi %s2105_s27, %s2557_s27   ;;  %s1966_s4 = sphi %s2103_s4, %s2556_s4  }
  0x1b   : > { %2522 = sst [smem:[#allocation16_spill]] %s1974_s28  ;;  %s1601_s0 = sadd.s32 4294967294, %s1978_s29  }
  0x1c   : > { %2523 = sst [smem:[#allocation17_spill]] %s1978_s29  ;;  %s2128_s30 = sadd.s32 1, %s1978_s29  }
  0x1d   : > { %2524 = sst [smem:[#allocation18_spill]] %s2128_s30  ;;  %s52_s20 = sadd.s32 1, %s1974_s28 }
  0x1e   : > { %s49_s21 = ssub.s32 %s1978_s29, %s2128_s30  ;;  %p59_p3 = scmp.ne.s32.totalorder %s1974_s28, %s1970_s27 }
  0x1f   : > { %p50_p4 = scmp.eq.s32.totalorder %s49_s21, 0  ;;  %p60_p5 = scmp.eq.s32.totalorder %s1978_s29, 0 }
  0x20   : > { %p65_p6 = scmp.ne.s32.totalorder %s1970_s27, %s1966_s4  ;;  %p66_p7 = scmp.eq.s32.totalorder %s2124_s12, 0 }
  0x21   : > { %s2140_s1 = scalar_select %p50_p4, %s1974_s28, %s52_s20  }
  0x22   : > { %p2142_p8 = por %p60_p5, %p59_p3  ;;  %p2146_p9 = por %p66_p7, %p65_p6 }
  0x23   : > { %2525 = sst [smem:[#allocation19_spill]] %s2140_s1  ;;  %p440_p10 = scmp.eq.s32.totalorder %s2124_s12, 1 }
  0x24   : > { %s2527_s2 = scalar_select %p2146_p9, 1, 0 }
  0x25   : > { %p446_p11 = scmp.eq.s32.totalorder %s1601_s0, 1  ;;  %p1781_p13 = scmp.lt.s32.totalorder %s1978_s29, 2 }
  0x26   : > { %p2153_p0 = por %p440_p10, %p59_p3  ;;  %s2162_s25 = sand.u32 1, %s1974_s28  }
  0x27   : > { %p2157_p1 = por %p446_p11, %p65_p6  ;;  %s1604_s3 = sshll.u32 %s1978_s29, 4 }
  0x28   : > { %s2528_s23 = scalar_select %p2153_p0, 1, 0 }
  0x29   : > { %s2530_s24 = scalar_select %p2157_p1, 1, 0 }
  0x2a   : > { %2529 = sst [smem:[#allocation20_spill]] %s2528_s23  ;;  %s2532_s21 = sld [smem:[#allocation23_spill]] }
  0x2b   : > { %2531 = sst [smem:[#allocation21_spill]] %s2530_s24  ;;  %s534_s0 = scalar_lea.vmem [#allocation5], %s2162_s25 }
  0x2c   : > { %s541_s30 = sshll.u32 %s534_s0, 4  ;;  %p2175_p2 = pnand %p1781_p13, %p2142_p8  ;;  %s2171_s30 = int_to_ptr.vmem [resolvable:$true] %s541_s30 }
  0x2d   : > { %s532_s26 = scalar_lea.sflag [#allocation6], %s2162_s25 }
  0x2e   : > { %p1848_p6 = pneg %p2175_p2 }
  0x30   : > { %s2168_s1 = scalar_lea.hbm %s2532_s21, %s1604_s3  ;;  %s1851_s22 = scalar_lea.hbm %s2532_s21, 32 }
  0x31   : > { %s1846_s3 = scalar_lea.hbm %s2168_s1, 16  ;;  %p1852_p8 = scmp.lt.u32.totalorder %s2168_s1, %s2532_s21 }
  0x32   : > { %p1847_p5 = scmp.ne.s32.totalorder %s2168_s1, %s1846_s3  ;;  %p1853_p11 = scmp.lt.u32.totalorder %s1851_s22, %s1846_s3 }
  0x33   : > { %p1855_p12 = scmp.lt.u32.totalorder %s1846_s3, %s2168_s1 }
  0x34   : > { %p1849_p7 = pnand %p1848_p6, %p1847_p5  ;;  %p1854_p13 = por %p1853_p11, %p1852_p8 }
  0x36   : > { %p1850_p10 = pneg %p1849_p7  ;;  %p1856_p3 = por %p1855_p12, %p1854_p13 }
  0x38   : > { %p1857_p4 = pnand %p1856_p3, %p1850_p10 }
  0x3a   : > { %1860 = shalt.err (!%p1857_p4)
}
  0x3b   : > { %s1861_s18 = scalar_lea.vmem %s2171_s30, 16  ;;  %s1981_s20 = smov [#allocation5]  }
  0x3c   : > { %p1862_p5 = scmp.ne.s32.totalorder %s2171_s30, %s1861_s18  ;;  %s1866_s0 = sshll.u32 %s1981_s20, 4  ;;  %s1867_s0 = int_to_ptr.vmem [resolvable:$false] %s1866_s0 }
  0x3d   : > { %s1868_s4 = scalar_lea.vmem %s1867_s0, 32  ;;  %p1869_p0 = scmp.lt.s32.totalorder %s2171_s30, %s1867_s0 }
  0x3e   : > { %p1864_p7 = pnand %p1862_p5, %p1848_p6  ;;  %p1870_p8 = scmp.lt.s32.totalorder %s1868_s4, %s1861_s18 }
  0x40   : > { %p1865_p1 = pneg %p1864_p7  ;;  %p1871_p11 = por %p1870_p8, %p1869_p0 }
  0x42   : > { %p1872_p12 = pnand %p1871_p11, %p1865_p1 }
  0x44   : > { %1875 = shalt.err (!%p1872_p12)
}
  0x45   : > { %1773 = dma.hbm_to_vmem [thread:$0]  (!%p2175_p2), %s2168_s1, 16, %s2171_s30, %s532_s26  }
  0x46   : > { %p2534_p3 = scmp.lt.s32.totalorder %s1978_s29, 3  ;;  %p2535_p4 = scmp.ge.s32.totalorder %s1978_s29, 1 }
  0x47   : > { %s1605_s18 = sshll.u32 %s2162_s25, 2  ;;  %s1606_s3 = sshll.u32 %s1978_s29, 6 }
  0x48   : > { %p2211_p10 = pnand %p2535_p4, %p2534_p3  ;;  %s2537_s0 = sld [smem:[#allocation24_spill]] }
  0x49   : > { %s552_s21 = scalar_lea.vmem [#allocation8], %s1605_s18  ;;  %s549_s30 = scalar_lea.sflag [#allocation9], %s2162_s25 }
  0x4a   : > { %s2536_s24 = scalar_select %p2211_p10, 1, 0 }
  0x4b   : > { %s559_s23 = sshll.u32 %s552_s21, 4  ;;  %s560_s23 = int_to_ptr.vmem [resolvable:$true] %s559_s23 }
  0x4e   : > { %s2220_s4 = scalar_lea.hbm %s2537_s0, %s1606_s3  ;;  %s1881_s22 = scalar_lea.hbm %s2537_s0, 128 }
  0x4f   : > { %s1876_s1 = scalar_lea.hbm %s2220_s4, 64  ;;  %p1882_p5 = scmp.lt.u32.totalorder %s2220_s4, %s2537_s0 }
  0x50   : > { %p1877_p0 = scmp.ne.s32.totalorder %s2220_s4, %s1876_s1  ;;  %p1883_p7 = scmp.lt.u32.totalorder %s1881_s22, %s1876_s1 }
  0x51   : > { %p1885_p11 = scmp.lt.u32.totalorder %s1876_s1, %s2220_s4 }
  0x52   : > { %p1879_p1 = pnand %p1877_p0, %p1848_p6  ;;  %p1884_p8 = por %p1883_p7, %p1882_p5 }
  0x54   : > { %p1880_p13 = pneg %p1879_p1  ;;  %p1886_p12 = por %p1885_p11, %p1884_p8 }
  0x56   : > { %p1887_p3 = pnand %p1886_p12, %p1880_p13 }
  0x58   : > { %1890 = shalt.err (!%p1887_p3)
}
  0x59   : > { %s1891_s25 = scalar_lea.vmem %s560_s23, 64  ;;  %s1982_s21 = smov [#allocation8]  }
  0x5a   : > { %p1892_p4 = scmp.ne.s32.totalorder %s560_s23, %s1891_s25  ;;  %s1896_s29 = sshll.u32 %s1982_s21, 4  ;;  %s1897_s29 = int_to_ptr.vmem [resolvable:$false] %s1896_s29 }
  0x5b   : > { %s1898_s18 = scalar_lea.vmem %s1897_s29, 128  ;;  %p1899_p9 = scmp.lt.s32.totalorder %s560_s23, %s1897_s29 }
  0x5c   : > { %p1894_p0 = pnand %p1892_p4, %p1848_p6  ;;  %p1900_p10 = scmp.lt.s32.totalorder %s1898_s18, %s1891_s25 }
  0x5e   : > { %p1895_p1 = pneg %p1894_p0  ;;  %p1901_p5 = por %p1900_p10, %p1899_p9 }
  0x60   : > { %p1902_p7 = pnand %p1901_p5, %p1895_p1 }
  0x62   : > { %1905 = shalt.err (!%p1902_p7)
}
  0x63   : > { %1776 = dma.hbm_to_vmem [thread:$0]  (!%p2175_p2), %s2220_s4, 64, %s560_s23, %s549_s30  }
  0x64   : > { %p2538_p13 = scmp.ne.s32.totalorder %s2536_s24, 0 }
  0x65   : > { %s2245_s1 = sand.u32 (!%p2538_p13), 1, %s1970_s27   ;;  %p2539_p6 = scmp.ne.s32.totalorder (!%p2538_p13), %s2527_s2, 0 }
  0x66   : > { %582 = sbr.rel (%p2538_p13) target bundleno = 1576 (0x628), region = 88  ;;  %s585_s26 = scalar_lea.sflag (!%p2538_p13), [#allocation6], %s2245_s1 }
  0x67   : > { %s587_s22 = scalar_lea.vmem (!%p2538_p13), [#allocation5], %s2245_s1 }
  0x6d   : > { %1953 = dma.done.wait (%p2539_p6), %s585_s26, 16  }
  0x6e   : > { %1955 = vsyncadd (%p2539_p6), %s585_s26, 4294967280  ;;  %s1608_s28 = sshll.u32 %s2245_s1, 2  ;;  %s593_s23 = scalar_lea.sflag [#allocation9], %s2245_s1 }
  0x6f   : > { %s2255_s24 = scalar_lea.vmem [#allocation8], %s1608_s28 }
  0x70   : > { %1957 = dma.done.wait (%p2539_p6), %s593_s23, 64  }
  0x71   : > { %1959 = vsyncadd (%p2539_p6), %s593_s23, 4294967232  ;;  %v1983_v1 = vmov 0.0|0.0   ;;  %vm1984_vm0 = vmmov 0   ;;  %v1985_v2 = vmov 0.0   ;;  %v679_v3 = vld [vmem:[%s2484_s5] sm:$0xff]  ;;  %v680_v4 = vld [vmem:[%s2484_s5 + $0x8] sm:$0xff] }
  0x72   : > { %1731 = vmatprep.subr.bf16.mxu0 %v1983_v1  ;;  %1677 = vmatprep.mubr.msk.f32.mxu0 %vm1984_vm0, %v1985_v2  ;;  %v681_v5 = vld [vmem:[%s2484_s5 + $0x10] sm:$0xff]  ;;  %v1732_v6 = vpack.c.bf16 %v680_v4, %v679_v3  ;;  %v682_v7 = vld [vmem:[%s2484_s5 + $0x18] sm:$0xff]  ;;  %v683_v9 = vld [vmem:[%s2484_s5 + $0x20] sm:$0xff]  ;;  %vm688_vm1 = vcmask 523264   ;;  %vm792_vm3 = vcmask 130048   ;;  %p665_p9 = scmp.lt.s32.totalorder %s2124_s12, 1 }
  0x73   : > { %1743 = vmatprep.subr.bf16.mxu1 %v1983_v1  ;;  %1684 = vmatprep.mubr.msk.f32.mxu1 %vm1984_vm0, %v1985_v2  ;;  %v1735_v8 = vpack.c.bf16 %v682_v7, %v681_v5  ;;  %v684_v10 = vld [vmem:[%s2484_s5 + $0x28] sm:$0xff]  ;;  %v685_v12 = vld [vmem:[%s2484_s5 + $0x30] sm:$0xff]  ;;  %v686_v13 = vld [vmem:[%s2484_s5 + $0x38] sm:$0xff]  ;;  %s2540_s23 = sld [smem:[#allocation25_spill]]  ;;  %s2541_s21 = sld [smem:[#allocation26_spill]]  ;;  %vm1235_vm5 = vcmask 261120  }
  0x74   : > { %1733 = vmatpush3.bf16.msra.mxu0 %v1732_v6  ;;  %v1738_v11 = vpack.c.bf16 %v684_v10, %v683_v9  ;;  %v1741_v14 = vpack.c.bf16 %v686_v13, %v685_v12  ;;  %v678_v15 = vld [vmem:[%s587_s22] sm:$0x1]  ;;  %v790_v17 = vld [vmem:[%s2486_s7 + $0x8] sm:$0xff]  ;;  %s2338_s22 = scalar_select %p665_p9, %s2124_s12, 1  ;;  %vm1058_vm6 = vcmask 3072   ;;  %vm1391_vm8 = vcmask 64512  }
  0x75   : > { %1734 = vmatprep.subr.bf16.mxu0 %v1983_v1  ;;  %v789_v16 = vld [vmem:[%s2486_s7] sm:$0xff]  ;;  %v868_v45 = vld [vmem:[%s2488_s9 + $0x8] sm:$0xff]  ;;  %s677_s2 = sld [smem:[#allocation3 + %s2124_s12]]  ;;  %s1986_s20 = smov 16  }
  0x76   : > { %v1744_v18 = vpack.c.bf16 %v790_v17, %v789_v16  ;;  %v687_v19 = vld [vmem:[%s2485_s6] sm:$0x1]  ;;  %v866_v51 = vld [vmem:[%s2255_s24] sm:$0xf]  ;;  %s1610_s18 = sshll.u32 %s2338_s22, 3  ;;  %s1612_s26 = sshll.u32 %s2338_s22, 2 }
  0x77   : > { %v867_v44 = vld [vmem:[%s2488_s9] sm:$0xff]  ;;  %v977_v53 = vld [vmem:[%s2490_s11 + $0x8] sm:$0xff]  ;;  %s1609_s24 = sshll.u32 %s2245_s1, 3  ;;  %s2544_s25 = sld [smem:[#allocation20_spill]] }
  0x78   : > { %1736 = vmatpush3.bf16.msra.mxu0 %v1735_v8  ;;  %1745 = vmatpush3.bf16.msra.mxu1 %v1744_v18  ;;  %v1747_v49 = vpack.c.bf16 %v868_v45, %v867_v44  ;;  %v976_v52 = vld [vmem:[%s2490_s11] sm:$0xff]  ;;  %v1062_v56 = vld [vmem:[%s2492_s14 + $0x8] sm:$0xff]  ;;  %s1443_s30 = scalar_lea.sflag [#allocation7], %s2245_s1  ;;  %s1987_s3 = smov [#allocation10]  }
  0x79   : > { %1737 = vmatprep.subr.bf16.mxu0 %v1983_v1  ;;  %1746 = vmatprep.subr.bf16.mxu1 %v1983_v1  ;;  %v1750_v54 = vpack.c.bf16 %v977_v53, %v976_v52  ;;  %v1061_v55 = vld [vmem:[%s2492_s14] sm:$0xff]  ;;  %s668_s4 = scalar_lea.vmem %s2540_s23, %s1610_s18  ;;  %s672_s29 = scalar_lea.vmem %s2541_s21, %s1610_s18 }
  0x7a   : > { %v1756_v57 = vpack.c.bf16 %v1062_v56, %v1061_v55  ;;  %v2347_v58 = vld [vmem:[%s668_s4] sm:$0xff]  ;;  %s676_s4 = scalar_lea.vmem %s2497_s19, %s1612_s26  ;;  %s1627_s21 = sshll.u32 %s2124_s12, 7 }
  0x7b   : > { %v1615_v61 = vld [vmem:[%s2489_s10] ss:$0 sm:$0xff] }
  0x7c   : > { %1739 = vmatpush3.bf16.msra.mxu0 %v1738_v11 }
  0x7d   : > { %1740 = vmatprep.subr.bf16.mxu0 %v1983_v1  ;;  %p2547_p10 = scmp.ne.s32.totalorder %s2544_s25, 0 }
  0x80   : > { %1742 = vmatpush3.bf16.msra.mxu0 %v1741_v14 }
  0x81   : > { %1755 = vmatprep.subr.bf16.mxu0 %v1983_v1 }
  0x83   : > { %1678 = vmatmul.mubr.msk.f32.vlgmr.msra.gmra.mrb[0].mxu0 %vm688_vm1, %v678_v15 }
  0x84   : > { %1712 = vmatprep.mubr.msk.f32.mxu0 %vm1984_vm0, %v1985_v2  ;;  %1757 = vmatpush3.bf16.msra.mxu0 %v1756_v57 }
  0x85   : > { %1726 = vmatprep.subr.mxu0 %v1985_v2 }
  0x87   : > { %1713 = vmatmul.mubr.msk.f32.vlgmr.msra.gmra.mrb[2].mxu0 %vm792_vm3, %v2347_v58 }
  0x88   : > { %1728 = vmatprep.mubr.msk.f32.mxu0 %vm1984_vm0, %v1985_v2 }
 0x156   : > { %v758_v20 = vpop.f32.mrb[0].mxu0 }
 0x157   : > { %v759_v21 = vadd.f32 %v758_v20, %v687_v19  ;;  %v1679_v22 = vpop.f32.mrb[1].mxu0 }
 0x159   : > { %v763_v23 = vmul.f32 0.70710677, %v759_v21  ;;  %v762_v47 = vmul.f32 0.5, %v759_v21 }
 0x15b   : > { %v764_v24 = vand.u32 2147483647, %v763_v23  ;;  %vm784_vm2 = vcmp.ge.f32.partialorder %v763_v23, 0.0 }
 0x15d   : > { %v765_v25 = vmul.f32 0.3275911, %v764_v24  ;;  %v778_v27 = vsub.f32 0.0, %v764_v24 }
 0x15f   : > { %v766_v26 = vadd.f32 1.0, %v765_v25  ;;  %v779_v29 = vmul.f32 %v778_v27, %v764_v24  ;;  %v1063_v24 = vld [vmem:[%s2491_s13] sm:$0xff]  ;;  %v1064_v25 = vld [vmem:[%s2491_s13 + $0x8] sm:$0xff] }
 0x161   : > { %1820 = vrcp.f32 %v766_v26  ;;  %v780_v32 = vmul.f32 1.442695, %v779_v29  ;;  %v1753_v29 = vpack.c.bf16 %v1064_v25, %v1063_v24 }
 0x163   : > { %1822 = vpow2.f32 %v780_v32 }
 0x16b   : > { %v1821_v28 = vpop.eup %1820 }
 0x16c   : > { %v769_v30 = vmul.f32 1.0614054, %v1821_v28 }
 0x16d   : > { %v1823_v40 = vpop.eup %1822 }
 0x16e   : > { %v770_v31 = vadd.f32 -1.4531521, %v769_v30 }
 0x170   : > { %v771_v33 = vmul.f32 %v1821_v28, %v770_v31  ;;  %v791_v31 = vld [vmem:[%s2487_s8] sm:$0x1] }
 0x172   : > { %v772_v34 = vadd.f32 1.4214138, %v771_v33  ;;  %v1224_v33 = vld [vmem:[%s2494_s16] sm:$0xff] }
 0x174   : > { %v773_v35 = vmul.f32 %v1821_v28, %v772_v34  ;;  %v1225_v34 = vld [vmem:[%s2494_s16 + $0x8] sm:$0xff] }
 0x176   : > { %v774_v36 = vadd.f32 -0.28449672, %v773_v35  ;;  %v1759_v35 = vpack.c.bf16 %v1225_v34, %v1224_v33 }
 0x178   : > { %v775_v37 = vmul.f32 %v1821_v28, %v774_v36  ;;  %v1211_v36 = vpop.f32.mrb[2].mxu0 }
 0x17a   : > { %v776_v38 = vadd.f32 0.2548296, %v775_v37  ;;  %v1714_v37 = vpop.f32.mrb[3].mxu0 }
 0x17c   : > { %v777_v39 = vmul.f32 %v1821_v28, %v776_v38  ;;  %v1226_v38 = vld [vmem:[%s2494_s16 + $0x10] sm:$0xff] }
 0x17e   : > { %v782_v41 = vmul.f32 %v1823_v40, %v777_v39  ;;  %v1309_v40 = vld [vmem:[%s672_s29] sm:$0xff]  ;;  %s658_s29 = scalar_lea.vmem [#allocation10], %s1609_s24 }
 0x17f   : > { %1727 = vmatpush3.xpose.msk.msra.mxu0 %vm1235_vm5, %v1309_v40  ;;  %s1460_s26 = sshll.u32 %s658_s29, 4  ;;  %s2436_s26 = int_to_ptr.vmem [resolvable:$true] %s1460_s26 }
 0x180   : > { %v783_v42 = vsub.f32 1.0, %v782_v41  ;;  %v1617_v41 = vld [vmem:[#allocation4] ss:$0 sm:$0xff]  ;;  %s1906_s12 = scalar_lea.vmem %s2436_s26, 128 }
 0x181   : > { %p1907_p2 = scmp.ne.s32.totalorder %s2436_s26, %s1906_s12 }
 0x182   : > { %v785_v43 = vsub.f32 0.0, %v783_v42 }
 0x183   : > { %p1908_p8 = pnand %p1907_p2, %p2547_p10 }
 0x184   : > { %v786_v46 = vsel %vm784_vm2, %v783_v42, %v785_v43 }
 0x185   : > { %v787_v48 = vadd.f32 1.0, %v786_v46  ;;  %p1909_p11 = pneg %p1908_p8 }
 0x187   : > { %v788_v50 = vmul.f32 %v787_v48, %v762_v47 }
 0x189   : > { %1685 = vmatmul.mubr.msk.f32.vlgmr.msra.gmra.mrb[0].mxu1 %vm792_vm3, %v788_v50  ;;  %v1621_v50 = vld [vmem:[%s2493_s15] ss:$0 sm:$0xff] }
 0x18a   : > { %1748 = vmatpush3.bf16.msra.mxu1 %v1747_v49  ;;  %1691 = vmatprep.mubr.msk.f32.mxu1 %vm1984_vm0, %v1985_v2 }
 0x18b   : > { %1749 = vmatprep.subr.bf16.mxu1 %v1983_v1 }
 0x18d   : > { %1692 = vmatmul.mubr.msk.f32.vlgmr.msra.gmra.mrb[2].mxu1 %vm792_vm3, %v866_v51 }
 0x18e   : > { %1698 = vmatprep.mubr.msk.f32.mxu1 %vm1984_vm0, %v1985_v2  ;;  %1751 = vmatpush3.bf16.msra.mxu1 %v1750_v54  ;;  %v1622_v54 = vld [vmem:[%s2495_s17] ss:$0 sm:$0xff] }
 0x18f   : > { %1752 = vmatprep.subr.bf16.mxu1 %v1983_v1 }
 0x25c   : > { %v862_v59 = vpop.f32.mrb[0].mxu1 }
 0x25d   : > { %v1686_v60 = vpop.f32.mrb[1].mxu1  ;;  %v2368_v32 = vadd.f32 %v862_v59, %v791_v31  ;;  %v1388_v59 = vstv %s677_s2  ;;  %s1910_s2 = sshll.u32 %s1987_s3, 4  ;;  %s1911_s2 = int_to_ptr.vmem [resolvable:$false] %s1910_s2 }
 0x25e   : > { %p1913_p12 = scmp.lt.s32.totalorder %s2436_s26, %s1911_s2 }
 0x260   : > { %v945_v62 = vpop.f32.mrb[2].mxu1 }
 0x261   : > { %v946_v63 = vadd.f32 %v1615_v61, %v945_v62  ;;  %v1693_v0 = vpop.f32.mrb[3].mxu1 }
 0x263   : > { %v950_v3 = vmul.f32 0.70710677, %v946_v63  ;;  %v949_v27 = vmul.f32 0.5, %v946_v63 }
 0x265   : > { %v951_v4 = vand.u32 2147483647, %v950_v3  ;;  %vm971_vm4 = vcmp.ge.f32.partialorder %v950_v3, 0.0 }
 0x267   : > { %v952_v5 = vmul.f32 0.3275911, %v951_v4  ;;  %v965_v7 = vsub.f32 0.0, %v951_v4 }
 0x269   : > { %v953_v6 = vadd.f32 1.0, %v952_v5  ;;  %v966_v9 = vmul.f32 %v965_v7, %v951_v4 }
 0x26b   : > { %1824 = vrcp.f32 %v953_v6  ;;  %v967_v12 = vmul.f32 1.442695, %v966_v9 }
 0x26d   : > { %1826 = vpow2.f32 %v967_v12 }
 0x275   : > { %v1825_v8 = vpop.eup %1824 }
 0x276   : > { %v956_v10 = vmul.f32 1.0614054, %v1825_v8 }
 0x277   : > { %v1827_v20 = vpop.eup %1826 }
 0x278   : > { %v957_v11 = vadd.f32 -1.4531521, %v956_v10 }
 0x27a   : > { %v958_v13 = vmul.f32 %v1825_v8, %v957_v11 }
 0x27c   : > { %v959_v14 = vadd.f32 1.4214138, %v958_v13 }
 0x27e   : > { %v960_v15 = vmul.f32 %v1825_v8, %v959_v14 }
 0x280   : > { %v961_v16 = vadd.f32 -0.28449672, %v960_v15 }
 0x282   : > { %v962_v17 = vmul.f32 %v1825_v8, %v961_v16 }
 0x284   : > { %v963_v18 = vadd.f32 0.2548296, %v962_v17 }
 0x286   : > { %v964_v19 = vmul.f32 %v1825_v8, %v963_v18 }
 0x288   : > { %v969_v21 = vmul.f32 %v1827_v20, %v964_v19 }
 0x28a   : > { %v970_v22 = vsub.f32 1.0, %v969_v21 }
 0x28c   : > { %v972_v23 = vsub.f32 0.0, %v970_v22 }
 0x28e   : > { %v973_v26 = vsel %vm971_vm4, %v970_v22, %v972_v23 }
 0x28f   : > { %v974_v28 = vadd.f32 1.0, %v973_v26 }
 0x291   : > { %v975_v30 = vmul.f32 %v974_v28, %v949_v27 }
 0x293   : > { %1699 = vmatmul.mubr.msk.f32.vlgmr.msra.gmra.mrb[4].mxu1 %vm792_vm3, %v975_v30 }
 0x294   : > { %1754 = vmatpush3.bf16.msra.mxu1 %v1753_v29  ;;  %1705 = vmatprep.mubr.msk.f32.mxu1 %vm1984_vm0, %v1985_v2 }
 0x295   : > { %1758 = vmatprep.subr.bf16.mxu1 %v1983_v1 }
 0x297   : > { %1706 = vmatmul.mubr.msk.f32.vlgmr.msra.gmra.mrb[6].mxu1 %vm792_vm3, %v2368_v32 }
 0x298   : > { %1723 = vmatprep.mubr.msk.f32.mxu1 %vm1984_vm0, %v1985_v2  ;;  %1760 = vmatpush3.bf16.msra.mxu1 %v1759_v35  ;;  %v1227_v2 = vld [vmem:[%s2494_s16 + $0x18] sm:$0xff] }
 0x299   : > { %1761 = vmatprep.subr.bf16.mxu1 %v1983_v1  ;;  %v1762_v39 = vpack.c.bf16 %v1227_v2, %v1226_v38  ;;  %v1138_v1 = vlaneseq }
 0x29b   : > { %v2395_v42 = vshrl.u32 %v1138_v1, 7 }
 0x29c   : > { %1763 = vmatpush3.bf16.msra.mxu1 %v1762_v39 }
 0x29d   : > { %v1140_v46 = vsub.s32 0, %v2395_v42  ;;  %vm2413_vm7 = vcmp.ge.s32.totalorder %v2395_v42, %v1388_v59 }
 0x29f   : > { %v1435_v40 = vrot.slane %v2368_v32, %v1140_v46 }
 0x366   : > { %v1054_v43 = vpop.f32.mrb[4].mxu1 }
 0x367   : > { %v1055_v44 = vadd.f32 %v1617_v41, %v1054_v43  ;;  %v1700_v45 = vpop.f32.mrb[5].mxu1 }
 0x369   : > { %1059 = vst.msk [vmem:[%s676_s4] sm:$0xf] %vm1058_vm6, %v1055_v44  ;;  %s2545_s4 = sld [smem:[#allocation27_spill]] }
 0x36a   : > { %v1134_v47 = vpop.f32.mrb[6].mxu1 }
 0x36b   : > { %v1141_v48 = vrot.slane %v1134_v47, %v1140_v46  ;;  %v1707_v49 = vpop.f32.mrb[7].mxu1 }
 0x36d   : > { %v1212_v51 = vadd.f32 %v1211_v36, %v1141_v48 }
 0x36f   : > { %v1222_v52 = vadd.f32 %v1621_v50, %v1212_v51  ;;  %s2546_s22 = smov %s2545_s4  ;;  %s2434_s18 = scalar_lea.hbm %s2545_s4, %s1627_s21 }
 0x371   : > { %v1223_v53 = vmax.f32 %v1222_v52, 0.0 }
 0x373   : > { %1724 = vmatmul.mubr.msk.f32.vlgmr.msra.gmra.mrb[8].mxu1 %vm1235_vm5, %v1223_v53 }
 0x446   : > { %v1305_v55 = vpop.f32.mrb[8].mxu1 }
 0x447   : > { %v1306_v56 = vadd.f32 %v1622_v54, %v1305_v55  ;;  %v1725_v57 = vpop.f32.mrb[9].mxu1 }
 0x449   : > { %1729 = vmatmul.mubr.msk.f32.vlgmr.msra.gmra.mrb[4].mxu0 %vm1235_vm5, %v1306_v56 }
 0x51c   : > { %v1382_v61 = vpop.f32.mrb[4].mxu0 }
 0x51d   : > { %v1390_v62 = vsel %vm2413_vm7, -1e+18, %v1382_v61  ;;  %v1730_v63 = vpop.f32.mrb[5].mxu0 }
 0x51e   : > { %v1392_v0 = vsel %vm1391_vm8, %v1390_v62, -inf }
 0x51f   : > { %v1393_v3 = vrot.slane %v1392_v0, 4 }
 0x521   : > { %v1394_v4 = vmax.f32 %v1392_v0, %v1393_v3 }
 0x523   : > { %v1395_v5 = vrot.slane %v1394_v4, 2 }
 0x525   : > { %v1396_v6 = vmax.f32 %v1394_v4, %v1395_v5 }
 0x527   : > { %v1397_v7 = vrot.slane %v1396_v6, 1 }
 0x529   : > { %v1398_v8 = vmax.f32 %v1396_v6, %v1397_v7 }
 0x52b   : > { %v1399_v9 = vsub.f32 %v1390_v62, %v1398_v8 }
 0x52d   : > { %v1400_v10 = vmul.f32 1.442695, %v1399_v9 }
 0x52f   : > { %1828 = vpow2.f32 %v1400_v10 }
 0x539   : > { %v1829_v11 = vpop.eup %1828 }
 0x53a   : > { %v1402_v12 = vsel %vm1391_vm8, %v1829_v11, 0.0 }
 0x53b   : > { %v1403_v13 = vrot.slane %v1402_v12, 4 }
 0x53d   : > { %v1404_v14 = vadd.f32 %v1403_v13, %v1402_v12 }
 0x53f   : > { %v1405_v15 = vrot.slane %v1404_v14, 2 }
 0x541   : > { %v1406_v16 = vadd.f32 %v1405_v15, %v1404_v14 }
 0x543   : > { %v1407_v17 = vrot.slane %v1406_v16, 1 }
 0x545   : > { %v1408_v18 = vadd.f32 %v1407_v17, %v1406_v16 }
 0x547   : > { %1830 = vrcp.f32 %v1408_v18 }
 0x551   : > { %v1831_v19 = vpop.eup %1830 }
 0x552   : > { %v1410_v20 = vmul.f32 %v1831_v19, %v1829_v11 }
 0x554   : > { %v1411_v21 = vsel %vm1391_vm8, %v1410_v20, 0.0 }
 0x555   : > { %1412 = vadd.xlane.f32.xlu0 %v1411_v21 }
 0x56b   : > { %1436 = vrot.lane.b32.xlu0 %v2347_v58, %s1986_s20  ;;  %s1912_s20 = scalar_lea.vmem %s1911_s2, 256 }
 0x56c   : > { %p1914_p3 = scmp.lt.s32.totalorder %s1912_s20, %s1906_s12 }
 0x56e   : > { %p1915_p4 = por %p1914_p3, %p1913_p12 }
 0x570   : > { %p1916_p0 = pnand %p1915_p4, %p1909_p11 }
 0x5e2   : > { %v1413_v22 = vpop.xlane.xlu0 %1412 }
 0x5e3   : > { %v1414_v23 = vsel %vm2413_vm7, -1e+18, %v1413_v22 }
 0x5e4   : > { %v1415_v24 = vrot.slane %v1414_v23, 4 }
 0x5e6   : > { %v1416_v25 = vmax.f32 %v1414_v23, %v1415_v24  ;;  %v1437_v2 = vpop.permute.xlu0 %1436 }
 0x5e7   : > { %v1439_v41 = vsel %vm792_vm3, %v1435_v40, %v1437_v2 }
 0x5e8   : > { %v1417_v26 = vrot.slane %v1416_v25, 2 }
 0x5ea   : > { %v1418_v27 = vmax.f32 %v1416_v25, %v1417_v26 }
 0x5ec   : > { %v1419_v28 = vrot.slane %v1418_v27, 1 }
 0x5ee   : > { %v1420_v29 = vmax.f32 %v1418_v27, %v1419_v28 }
 0x5f0   : > { %v1421_v30 = vsub.f32 %v1414_v23, %v1420_v29 }
 0x5f2   : > { %v1422_v31 = vmul.f32 1.442695, %v1421_v30 }
 0x5f4   : > { %1832 = vpow2.f32 %v1422_v31 }
 0x5fe   : > { %v1833_v33 = vpop.eup %1832 }
 0x5ff   : > { %v1424_v34 = vrot.slane %v1833_v33, 4 }
 0x601   : > { %v1425_v35 = vadd.f32 %v1833_v33, %v1424_v34 }
 0x603   : > { %v1426_v36 = vrot.slane %v1425_v35, 2 }
 0x605   : > { %v1427_v58 = vadd.f32 %v1426_v36, %v1425_v35 }
 0x607   : > { %v1428_v37 = vrot.slane %v1427_v58, 1 }
 0x609   : > { %v1429_v38 = vadd.f32 %v1428_v37, %v1427_v58 }
 0x60b   : > { %1834 = vrcp.f32 %v1429_v38 }
 0x615   : > { %v1835_v39 = vpop.eup %1834 }
 0x616   : > { %v1431_v1 = vmul.f32 %v1835_v39, %v1833_v33 }
 0x618   : > { %v1440_v43 = vmul.f32 %v1439_v41, %v1431_v1 }
 0x61a   : > { %1441 = vst.msk [vmem:[%s658_s29] sm:$0xff] %vm1235_vm5, %v1440_v43 }
 0x61b   : > { %1919 = shalt.err (!%p1916_p0)
}
 0x61c   : > { %s1920_s1 = scalar_lea.hbm %s2434_s18, 128  ;;  %s1924_s29 = scalar_lea.hbm %s2546_s22, 256 }
 0x61d   : > { %p1921_p1 = scmp.ne.s32.totalorder %s2434_s18, %s1920_s1  ;;  %p1925_p13 = scmp.lt.u32.totalorder %s2434_s18, %s2546_s22 }
 0x61e   : > { %p1926_p6 = scmp.lt.u32.totalorder %s1924_s29, %s1920_s1  ;;  %p1928_p2 = scmp.lt.u32.totalorder %s1920_s1, %s2434_s18 }
 0x61f   : > { %p1922_p5 = pnand %p1921_p1, %p2547_p10 }
 0x620   : > { %p1927_p9 = por %p1926_p6, %p1925_p13 }
 0x621   : > { %p1923_p7 = pneg %p1922_p5 }
 0x622   : > { %p1929_p8 = por %p1928_p2, %p1927_p9 }
 0x624   : > { %p1930_p11 = pnand %p1929_p8, %p1923_p7 }
 0x626   : > { %1933 = shalt.err (!%p1930_p11)
}
 0x627   : > { %1768 = dma.vmem_to_hbm [thread:$0]  (%p2547_p10), %s2436_s26, 128, %s2434_s18, %s1443_s30  }
 0x628 PF: > { %s2548_s4 = sld [smem:[#allocation15_spill]]  ;;  %s2549_s12 = sld [smem:[#allocation21_spill]] }
 0x629   : > { %s2550_s3 = sld [smem:[#allocation17_spill]] }
 0x62e   : > { %s1475_s2 = sand.u32 1, %s2548_s4   ;;  %p2551_p12 = scmp.ne.s32.totalorder %s2549_s12, 0 }
 0x62f   : > { %p2552_p3 = scmp.ge.s32.totalorder %s2550_s3, 2  ;;  %s1476_s20 = scalar_lea.sflag [#allocation7], %s1475_s2 }
 0x631   : > { %p1778_p4 = pnand %p2552_p3, %p2551_p12 }
 0x633   : > { %1961 = dma.done.wait (!%p1778_p4), %s1476_s20, 128  }
 0x634   : > { %1963 = vsyncadd (!%p1778_p4), %s1476_s20, 4294967168  ;;  %s2553_s29 = sld [smem:[#allocation18_spill]]  ;;  %s2554_s1 = sld [smem:[#allocation16_spill]] }
 0x635   : > { %s2555_s28 = sld [smem:[#allocation19_spill]]  ;;  %s2556_s4 = smov %s1970_s27 }
 0x63a   : > { %p42_p0 = scmp.ge.s32.totalorder %s2553_s29, 4   ;;  %s2557_s27 = smov %s2554_s1 }
 0x63c   :  { %44 = sbr.rel (!%p42_p0) target bundleno = 26 (0x1a), region = 164 }
 0x643   :  { %1488 = vsyncpa [#allocation6], 1 }
 0x644   :  { %1490 = vsyncpa [#allocation6 + $0x1], 1 }
 0x645   :  { %1491 = vsyncpa [#allocation9], 1 }
 0x646   :  { %1493 = vsyncpa [#allocation9 + $0x1], 1 }
 0x647   :  { %1494 = vsyncpa [#allocation7], 1 }
 0x648   :  { %1496 = vsyncpa [#allocation7 + $0x1], 1 }

</bundles_post_ra>
